<compile_context>
chip_gen: v5e
topology: v5e:2x2
jax: 0.10.0
libtpu: 0.0.40
codegen_flags: <defaults>
</compile_context>

<pallas_src>
import jax
import jax.numpy as jnp
from jax.experimental import pallas as pl
from jax.experimental.pallas import tpu as pltpu


def build_pe(d_model: int, max_len: int = 1000) -> jnp.ndarray:
    """Sinusoidal positional-encoding buffer, identical to the module __init__."""
    position = jnp.arange(max_len, dtype=jnp.float32)[:, None]            # (L, 1)
    div_term = jnp.exp(
        jnp.arange(0, d_model, 2, dtype=jnp.float32)
        * (-jnp.log(jnp.float32(10000.0)) / d_model)
    )                                                                      # (D/2,)
    pe = jnp.zeros((max_len, d_model), dtype=jnp.float32)
    pe = pe.at[:, 0::2].set(jnp.sin(position * div_term))
    pe = pe.at[:, 1::2].set(jnp.cos(position * div_term))
    return pe


def pe_add_kernel(x_ref, pe_ref, o_ref):
    # x block: (bi, Lt); pe block: (1, Lt).  Leading-axis broadcast implements
    # the .repeat; the add runs in the (promoted) output dtype.
    o_ref[...] = x_ref[...].astype(o_ref.dtype) + pe_ref[...].astype(o_ref.dtype)


def _round_up(n: int, m: int) -> int:
    return ((n + m - 1) // m) * m


def _detect_num_tensorcores() -> int:
    """Best-effort TensorCore count (v7x = 2).  Defaults to 1 if unknown."""
    try:
        info = pltpu.get_tpu_info()
    except Exception:
        return 1
    for name in ("num_cores", "num_tensorcores", "tensorcores_per_chip", "cores_per_chip"):
        n = getattr(info, name, None)
        if isinstance(n, int) and 1 <= n <= 8:
            return n
    return 1


def _choose_blocks(S: int, L: int, x_item: int, num_cores: int,
                   target_bytes: int = 6 << 20):
    """Pick (bi, Lt) for the flattened (S, L) view.

    Constraints honoured: bi is a multiple of 8 or equals S; Lt is a multiple
    of 128 or equals L (the (8,128) block rule).  Target ~6 MiB per x block.
    """
    elems_target = max(128, target_bytes // max(1, x_item))

    # Whole array fits in one block.
    if S * L <= elems_target:
        bi, Lt = S, L
        # Only split for multi-TensorCore chips and non-trivial sizes.
        if num_cores > 1 and S * L * x_item >= (1 << 20):
            if S >= 8 * num_cores:
                bi = min(S, _round_up(-(-S // num_cores), 8))
            elif L >= 128 * num_cores:
                Lt = min(L, _round_up(-(-L // num_cores), 128))
        return bi, Lt

    # Tile the leading (row) axis, keep the full lane extent.
    if S >= 8 and 8 * L <= elems_target:
        rows = elems_target // L                     # >= 8 here
        bi = min(S - (S % 8 if S % 8 else 0), (rows // 8) * 8)
        bi = max(8, bi)
        Lt = L
        # v7x balance: prefer a block count that is a multiple of the TC count,
        # but never by growing the block (VMEM budget stays intact).
        if num_cores > 1:
            gi = -(-S // bi)
            if gi > 1 and gi % num_cores != 0:
                gi2 = _round_up(gi, num_cores)
                bi2 = max(8, _round_up(-(-S // gi2), 8))
                if bi2 <= bi:
                    bi = bi2
        return bi, Lt

    # Huge rows (or S < 8): tile the flattened lane axis as well.
    bi = S if S < 8 else 8
    lanes = max(128, elems_target // bi)
    Lt = min(L, (lanes // 128) * 128)
    return bi, Lt


def positional_encoding_forward(x: jnp.ndarray, pe: jnp.ndarray) -> jnp.ndarray:
    S, S2, D = x.shape
    if S2 != S:
        raise ValueError(
            "reference .repeat(x.size(0),1,1) requires x.shape[1] == x.shape[0]")
    if pe.shape[0] < S:
        raise ValueError(
            f"sequence length {S} exceeds positional-encoding max_len {pe.shape[0]}")
    if pe.shape[1] != D:
        raise ValueError("pe feature dim must match x feature dim")

    # PyTorch promotes x + pe (pe is float32) -> keep that output dtype.
    out_dtype = jnp.promote_types(x.dtype, pe.dtype)

    # Lane-dense flattened views (free reshapes on contiguous arrays).
    L = S * D
    x2 = x.reshape(S, L)
    pe2 = pe[:S].reshape(1, L)        # left in its own dtype; cast in-kernel

    x_item = jnp.dtype(x.dtype).itemsize
    out_item = jnp.dtype(out_dtype).itemsize
    pe_item = jnp.dtype(pe.dtype).itemsize

    num_cores = _detect_num_tensorcores()
    bi, Lt = _choose_blocks(S, L, x_item, num_cores)
    grid = (pl.cdiv(S, bi), pl.cdiv(L, Lt))

    # Double-buffered x-in + out blocks + pe blocks, plus margin;
    # kept well under v7x's 64 MiB physical VMEM.
    need = 2 * bi * Lt * (x_item + out_item) + 2 * Lt * pe_item
    vmem_limit = min(48 << 20, max(32 << 20, int(need * 3 // 2)))

    out2 = pl.pallas_call(
        pe_add_kernel,
        out_shape=jax.ShapeDtypeStruct((S, L), out_dtype),
        grid=grid,
        in_specs=[
            # Streamed lane-dense x slabs.
            pl.BlockSpec((bi, Lt), lambda i, j: (i, j)),
            # pe tile depends only on the lane-block index; constant along the
            # row axis, so it stays resident whenever the lane axis is 1 block.
            pl.BlockSpec((1, Lt), lambda i, j: (0, j)),
        ],
        out_specs=pl.BlockSpec((bi, Lt), lambda i, j: (i, j)),
        compiler_params=pltpu.CompilerParams(
            dimension_semantics=("parallel", "parallel"),
            vmem_limit_bytes=vmem_limit,
        ),
    )(x2, pe2)

    return out2.reshape(S, S, D)


if __name__ == "__main__":
    S, D, MAX_LEN = 8, 32, 1000

    key = jax.random.PRNGKey(0)
    x = jax.random.normal(key, (S, S, D), dtype=jnp.float32)

    pe = build_pe(D, MAX_LEN)

    out = jax.block_until_ready(positional_encoding_forward(x, pe))

    # Pure-JAX reference of the exact PyTorch semantics.
    ref = x + jnp.broadcast_to(pe[:S][None, :, :], (S, S, D))
    assert out.shape == (S, S, D)
    assert out.dtype == ref.dtype
    assert jnp.allclose(out, ref, atol=1e-6, rtol=1e-6)

    print("KERNEL_OK")
</pallas_src>

<mosaic_0001>
module attributes {stable_mosaic.version = 11 : i64} {
  func.func @pe_add_kernel(%arg0: i32, %arg1: i32, %arg2: memref<8x256xf32, #tpu.memory_space<vmem>>, %arg3: memref<1x256xf32, #tpu.memory_space<vmem>>, %arg4: memref<8x256xf32, #tpu.memory_space<vmem>>) attributes {dimension_semantics = [#tpu.dimension_semantics<parallel>, #tpu.dimension_semantics<parallel>], iteration_bounds = array<i64: 1, 1>, scalar_prefetch = 0 : i64, scratch_operands = 0 : i64, tpu.core_type = #tpu.core_type<tc>, window_params = [{transform_indices = @transform_0, window_bounds = array<i64: 8, 256>}, {transform_indices = @transform_1, window_bounds = array<i64: 1, 256>}, {transform_indices = @transform_2, window_bounds = array<i64: 8, 256>}]} {
    %c0 = arith.constant 0 : index
    %c0_0 = arith.constant 0 : index
    %0 = vector.load %arg2[%c0, %c0_0] : memref<8x256xf32, #tpu.memory_space<vmem>>, vector<8x256xf32>
    %c0_1 = arith.constant 0 : index
    %c0_2 = arith.constant 0 : index
    %1 = vector.load %arg3[%c0_1, %c0_2] : memref<1x256xf32, #tpu.memory_space<vmem>>, vector<1x256xf32>
    %2 = vector.broadcast %1 : vector<1x256xf32> to vector<8x256xf32>
    %3 = arith.addf %0, %2 : vector<8x256xf32>
    %c0_3 = arith.constant 0 : index
    %c0_4 = arith.constant 0 : index
    %4 = vector.load %arg4[%c0_3, %c0_4] : memref<8x256xf32, #tpu.memory_space<vmem>>, vector<8x256xf32>
    tpu.vector_store %arg4[%c0_3, %c0_4], %3 {strides = array<i32>} : memref<8x256xf32, #tpu.memory_space<vmem>>, vector<8x256xf32>,
    return
  }
  func.func @transform_0(%arg0: i32, %arg1: i32) -> (i32, i32) {
    %c0_i32 = arith.constant 0 : i32
    return %arg0, %arg1 : i32, i32
  }
  func.func @transform_1(%arg0: i32, %arg1: i32) -> (i32, i32) {
    %c0_i32 = arith.constant 0 : i32
    %c0_i32_0 = arith.constant 0 : i32
    return %c0_i32, %arg1 : i32, i32
  }
  func.func @transform_2(%arg0: i32, %arg1: i32) -> (i32, i32) {
    %c0_i32 = arith.constant 0 : i32
    return %arg0, %arg1 : i32, i32
  }
}

</mosaic_0001>

<bundles_post_ra>
// kernel: tpu_custom_call.1
= control target key start
LH: loop header
LB: loop body
LE: loop exit
PB: predicated region body
PF: predicated region fallthrough
CT: control target
= control target key end

     0   :  { %7 = vsyncpa [#allocation3], 0  ;;  %s178_s0 = inlined_call_operand.hbm [shape: f32[8,256], index: 0, kind: input, shape index: {}]   ;;  %s179_s1 = inlined_call_operand.hbm [shape: f32[1,256], index: 1, kind: input, shape index: {}]   ;;  %s180_s2 = inlined_call_operand.hbm [shape: f32[8,256], index: 2, kind: output, shape index: {}]  }
   0x1   :  { %8 = vsyncpa [#allocation6], 0 }
   0x2   :  { %9 = vsyncpa [#allocation4], 0  ;;  %s15_s11 = sshll.u32 %s178_s0, 4  ;;  %s151_s12 = smov [#allocation2]   ;;  %s16_s11 = int_to_ptr.hbm [resolvable:$true] %s15_s11 }
   0x3   :  { %s17_s13 = sshll.u32 %s151_s12, 4  ;;  %s26_s16 = sshll.u32 %s179_s1, 4  ;;  %s18_s13 = int_to_ptr.vmem [resolvable:$true] %s17_s13  ;;  %s27_s16 = int_to_ptr.hbm [resolvable:$true] %s26_s16 }
   0x4   :  { %20 = dma.hbm_to_vmem [thread:$0]  %s16_s11, 256, %s18_s13, [#allocation3]  }
   0x5   :  { %s152_s17 = smov [#allocation5]  }
   0x6   :  { %s28_s18 = sshll.u32 %s152_s17, 4  ;;  %s29_s18 = int_to_ptr.vmem [resolvable:$true] %s28_s18 }
   0x7   :  { %31 = dma.hbm_to_vmem [thread:$0]  %s27_s16, 32, %s29_s18, [#allocation6]  }
   0x8   :  { %145 = dma.done.wait [#allocation3], 256  }
   0x9   :  { %146 = vsyncadd [#allocation3], 4294967040 }
   0xa   :  { %147 = dma.done.wait [#allocation6], 32  }
   0xb   :  { %148 = vsyncadd [#allocation6], 4294967264  ;;  %v40_v0 = vld [vmem:[#allocation2] sm:$0xff]  ;;  %v42_v1 = vld [vmem:[#allocation5] sm:$0x3]  ;;  %s153_s0 = smov [#allocation7]  }
   0xc   :  { %v41_v2 = vld [vmem:[#allocation2 + $0x8] sm:$0xff]  ;;  %v44_v3 = vperm.slane %v42_v1, 0  ;;  %v45_v4 = vperm.slane %v42_v1, 1  ;;  %s57_s19 = sshll.u32 %s153_s0, 4  ;;  %s59_s1 = sshll.u32 %s180_s2, 4  ;;  %s58_s19 = int_to_ptr.vmem [resolvable:$true] %s57_s19  ;;  %s60_s1 = int_to_ptr.hbm [resolvable:$true] %s59_s1 }
   0xe   :  { %v48_v5 = vadd.f32 %v44_v3, %v40_v0  ;;  %v49_v6 = vadd.f32 %v45_v4, %v41_v2 }
  0x10   :  { %50 = vst [vmem:[#allocation7] sm:$0xff] %v48_v5 }
  0x11   :  { %51 = vst [vmem:[#allocation7 + $0x8] sm:$0xff] %v49_v6 }
  0x12   :  { %62 = dma.vmem_to_hbm [thread:$0]  %s58_s19, 256, %s60_s1, [#allocation4]  }
  0x13   :  { %149 = dma.done.wait [#allocation4], 256  }
  0x14   :  { %150 = vsyncadd [#allocation4], 4294967040 }
  0x15   :  { %67 = vsyncpa [#allocation3], 1 }
  0x16   :  { %68 = vsyncpa [#allocation6], 1 }
  0x17   :  { %69 = vsyncpa [#allocation4], 1 }

</bundles_post_ra>
